<compile_context>
chip_gen: v5e
topology: v5e:2x2
jax: 0.10.0
libtpu: 0.0.40
codegen_flags: <defaults>
</compile_context>

<pallas_src>
import functools

import jax
import jax.numpy as jnp
from jax.experimental import pallas as pl
from jax.experimental.pallas import tpu as pltpu


def _round_up(x, m):
    return ((x + m - 1) // m) * m


def _patch_embed_kernel(p_ref, w_ref, b_ref, o_ref):
    # p_ref: (tm, K) bf16 patch tile, w_ref: (K, N_pad) bf16 (resident),
    # b_ref: (1, N_pad) f32 (resident), o_ref: (tm, N_pad) out tile.
    acc = jnp.dot(p_ref[...], w_ref[...], preferred_element_type=jnp.float32)
    o_ref[...] = (acc + b_ref[...]).astype(o_ref.dtype)


def patch_embed_forward(x, weight, bias, patch_size, *, tm_target=512):
    """x: (B, C, H, W) NCHW; weight: (E, C, ph, pw); bias: (E,).

    Returns (B, num_patches, E) == proj(x).flatten(2).transpose(1, 2)."""
    B, C, H, W = x.shape
    E = weight.shape[0]
    ph, pw = patch_size
    gh, gw = H // ph, W // pw
    num_patches = gh * gw
    out_dtype = x.dtype

    # ---- glue (plain JAX): image -> patch matrix, in bf16 ------------------
    # Cast before the rearrangement so the extra HBM pass moves bf16 bytes.
    # TODO(synk): fuse this NCHW -> (B*P, C*ph*pw) patch gather into the
    # kernel's own DMA (index_map over the 6-D view) to remove this
    # standalone XLA transpose pass entirely.
    xb = x.astype(jnp.bfloat16)
    xp = xb.reshape(B, C, gh, ph, gw, pw)
    xp = jnp.transpose(xp, (0, 2, 4, 1, 3, 5))          # (B, gh, gw, C, ph, pw)
    patches = xp.reshape(B * num_patches, C * ph * pw)  # (M, K)

    # conv weight (E, C, ph, pw) -> GEMM weight (K, E); bias -> (1, E) in f32.
    w_mat = weight.reshape(E, C * ph * pw).T.astype(jnp.bfloat16)
    b_mat = bias.astype(jnp.float32).reshape(1, E)

    M, K = patches.shape
    N = E

    # ---- padding / tiling ---------------------------------------------------
    N_pad = _round_up(N, 128)                # lane-dense output stores
    tm = min(tm_target, _round_up(M, 8))     # row tile, multiple of 8
    M_pad = _round_up(M, tm)

    if N_pad != N:
        w_mat = jnp.pad(w_mat, ((0, 0), (0, N_pad - N)))
        b_mat = jnp.pad(b_mat, ((0, 0), (0, N_pad - N)))
    if M_pad != M:
        patches = jnp.pad(patches, ((0, M_pad - M), (0, 0)))

    grid_m = M_pad // tm
    out_itemsize = jnp.dtype(out_dtype).itemsize

    cost = pl.CostEstimate(
        flops=2 * M_pad * K * N_pad,
        transcendentals=0,
        bytes_accessed=(patches.size * patches.dtype.itemsize
                        + w_mat.size * w_mat.dtype.itemsize
                        + b_mat.size * b_mat.dtype.itemsize
                        + M_pad * N_pad * out_itemsize),
    )

    out = pl.pallas_call(
        _patch_embed_kernel,
        out_shape=jax.ShapeDtypeStruct((M_pad, N_pad), out_dtype),
        grid_spec=pltpu.PrefetchScalarGridSpec(
            num_scalar_prefetch=0,
            grid=(grid_m,),
            in_specs=[
                # Patch rows stream through VMEM, one (tm, K) tile per step.
                pl.BlockSpec((tm, K), lambda i: (i, 0)),
                # Weight / bias: constant block index -> DMA'd once and kept
                # resident in VMEM across the whole M loop.
                pl.BlockSpec((K, N_pad), lambda i: (0, 0)),
                pl.BlockSpec((1, N_pad), lambda i: (0, 0)),
            ],
            out_specs=pl.BlockSpec((tm, N_pad), lambda i: (i, 0)),
        ),
        compiler_params=pltpu.CompilerParams(
            dimension_semantics=("parallel",),
            vmem_limit_bytes=40 * 1024 * 1024,
        ),
        cost_estimate=cost,
    )(patches, w_mat, b_mat)

    out = out[:M, :N]
    return out.reshape(B, num_patches, E)


if __name__ == "__main__":
    # Small shapes consistent with the module: img 16x16, patch 4x4,
    # in_chans=4, embed_dim=32, batch=2  ->  num_patches = 16.
    B, C, Hs, Ws = 2, 4, 16, 16
    patch = (4, 4)
    embed_dim = 32

    key = jax.random.PRNGKey(0)
    kx, kw, kb = jax.random.split(key, 3)

    x = jax.random.normal(kx, (B, C, Hs, Ws), dtype=jnp.float32)
    # Deterministic parameter init (synthetic; shapes from nn.Conv2d in __init__).
    weight = jax.random.normal(kw, (embed_dim, C, patch[0], patch[1]),
                               dtype=jnp.float32) * 0.02
    bias = jax.random.normal(kb, (embed_dim,), dtype=jnp.float32) * 0.02

    fwd = jax.jit(functools.partial(patch_embed_forward, patch_size=patch))
    out = jax.block_until_ready(fwd(x, weight, bias))

    # Reference (pure JAX conv with stride == kernel == patch size), in f32.
    ref = jax.lax.conv_general_dilated(
        x, weight, window_strides=patch, padding="VALID",
        dimension_numbers=("NCHW", "OIHW", "NCHW"))
    ref = ref + bias[None, :, None, None]
    ref = jnp.transpose(ref.reshape(B, embed_dim, -1), (0, 2, 1))

    assert out.shape == (B, (Hs // patch[0]) * (Ws // patch[1]), embed_dim)
    # bf16 inputs with f32 accumulation -> loosened tolerance vs pure-f32 ref.
    assert jnp.allclose(out, ref, atol=2e-2, rtol=2e-2)
    print("KERNEL_OK")
</pallas_src>

<mosaic_0001>
module attributes {stable_mosaic.version = 11 : i64} {
  func.func @_patch_embed_kernel(%arg0: i32, %arg1: memref<32x64xbf16, #tpu.memory_space<vmem>>, %arg2: memref<64x128xbf16, #tpu.memory_space<vmem>>, %arg3: memref<1x128xf32, #tpu.memory_space<vmem>>, %arg4: memref<32x128xf32, #tpu.memory_space<vmem>>) attributes {dimension_semantics = [#tpu.dimension_semantics<parallel>], iteration_bounds = array<i64: 1>, scalar_prefetch = 0 : i64, scratch_operands = 0 : i64, tpu.core_type = #tpu.core_type<tc>, window_params = [{transform_indices = @transform_0, window_bounds = array<i64: 32, 64>}, {pipeline_mode = #tpu.pipeline_mode<synchronous>, transform_indices = @transform_1, window_bounds = array<i64: 64, 128>}, {pipeline_mode = #tpu.pipeline_mode<synchronous>, transform_indices = @transform_2, window_bounds = array<i64: 1, 128>}, {transform_indices = @transform_3, window_bounds = array<i64: 32, 128>}]} {
    %c0 = arith.constant 0 : index
    %c0_0 = arith.constant 0 : index
    %0 = vector.load %arg1[%c0, %c0_0] : memref<32x64xbf16, #tpu.memory_space<vmem>>, vector<32x64xbf16>
    %c0_1 = arith.constant 0 : index
    %c0_2 = arith.constant 0 : index
    %1 = vector.load %arg2[%c0_1, %c0_2] : memref<64x128xbf16, #tpu.memory_space<vmem>>, vector<64x128xbf16>
    %cst = arith.constant dense<0.000000e+00> : vector<32x128xf32>
    %2 = tpu.matmul %0, %1, %cst {dimension_numbers = #tpu.dot_dimension_numbers<[1], [0], [0], [1], [0, 0, 1, 1], [], []>} : vector<32x64xbf16>, vector<64x128xbf16>, vector<32x128xf32> -> vector<32x128xf32>
    %c0_3 = arith.constant 0 : index
    %c0_4 = arith.constant 0 : index
    %3 = vector.load %arg3[%c0_3, %c0_4] : memref<1x128xf32, #tpu.memory_space<vmem>>, vector<1x128xf32>
    %4 = vector.broadcast %3 : vector<1x128xf32> to vector<32x128xf32>
    %5 = arith.addf %2, %4 : vector<32x128xf32>
    %c0_5 = arith.constant 0 : index
    %c0_6 = arith.constant 0 : index
    %6 = vector.load %arg4[%c0_5, %c0_6] : memref<32x128xf32, #tpu.memory_space<vmem>>, vector<32x128xf32>
    tpu.vector_store %arg4[%c0_5, %c0_6], %5 {strides = array<i32>} : memref<32x128xf32, #tpu.memory_space<vmem>>, vector<32x128xf32>,
    return
  }
  func.func @transform_0(%arg0: i32) -> (i32, i32) {
    %c0_i32 = arith.constant 0 : i32
    %c0_i32_0 = arith.constant 0 : i32
    return %arg0, %c0_i32 : i32, i32
  }
  func.func @transform_1(%arg0: i32) -> (i32, i32) {
    %c0_i32 = arith.constant 0 : i32
    %c0_i32_0 = arith.constant 0 : i32
    %c0_i32_1 = arith.constant 0 : i32
    return %c0_i32, %c0_i32_0 : i32, i32
  }
  func.func @transform_2(%arg0: i32) -> (i32, i32) {
    %c0_i32 = arith.constant 0 : i32
    %c0_i32_0 = arith.constant 0 : i32
    %c0_i32_1 = arith.constant 0 : i32
    return %c0_i32, %c0_i32_0 : i32, i32
  }
  func.func @transform_3(%arg0: i32) -> (i32, i32) {
    %c0_i32 = arith.constant 0 : i32
    %c0_i32_0 = arith.constant 0 : i32
    return %arg0, %c0_i32 : i32, i32
  }
}

</mosaic_0001>

<bundles_post_ra>
// kernel: patch_embed_forward.1
= control target key start
LH: loop header
LB: loop body
LE: loop exit
PB: predicated region body
PF: predicated region fallthrough
CT: control target
= control target key end

     0   :  { %s227_s0 = inlined_call_operand.vmem [shape: bf16[32,64], index: 0, kind: input, shape index: {}]   ;;  %s228_s1 = inlined_call_operand.vmem [shape: bf16[64,128], index: 1, kind: input, shape index: {}]   ;;  %s229_s2 = inlined_call_operand.vmem [shape: f32[1,128], index: 2, kind: input, shape index: {}]   ;;  %s230_s3 = inlined_call_operand.hbm [shape: f32[32,128], index: 3, kind: output, shape index: {}]  }
   0x1   :  { %v145_v0 = vld [vmem:[%s228_s1 + $0x18] sm:$0xff]  ;;  %v144_v1 = vld [vmem:[%s228_s1 + $0x10] sm:$0xff] }
   0x2   :  { %77 = vmatpush.bf16.msra.mxu0 %v145_v0  ;;  %146 = vmatpush.bf16.msra.mxu1 %v145_v0 }
   0x3   :  { %8 = vsyncpa [#allocation3], 0  ;;  %v143_v2 = vld [vmem:[%s228_s1 + $0x8] sm:$0xff]  ;;  %v142_v3 = vld [vmem:[%s228_s1] sm:$0xff]  ;;  %vm66_vm0 = vcmask 523264   ;;  %s180_s1 = smov [#allocation2]  }
   0x4   :  { %v140_v4 = vld [vmem:[%s227_s0] sm:$0xff]  ;;  %v141_v5 = vld [vmem:[%s227_s0 + $0x8] sm:$0xff]  ;;  %s100_s26 = sshll.u32 %s180_s1, 4  ;;  %s102_s0 = sshll.u32 %s230_s3, 4  ;;  %s101_s26 = int_to_ptr.vmem [resolvable:$true] %s100_s26  ;;  %s103_s0 = int_to_ptr.hbm [resolvable:$true] %s102_s0 }
   0x5   :  { %v153_v6 = vld [vmem:[%s229_s2] ss:$0 sm:$0xff]  ;;  %s181_s2 = smov 128   ;;  %s182_s29 = smov 8  }
   0x6   :  { %78 = vmatpush.bf16.msra.mxu0 %v144_v1  ;;  %147 = vmatpush.bf16.msra.mxu1 %v144_v1 }
   0xa   :  { %79 = vmatpush.bf16.msra.mxu0 %v143_v2  ;;  %148 = vmatpush.bf16.msra.mxu1 %v143_v2 }
   0xe   :  { %80 = vmatpush.bf16.msra.mxu0 %v142_v3  ;;  %149 = vmatpush.bf16.msra.mxu1 %v142_v3 }
  0x11   :  { %138 = vmatmul.msk.bf16.vlgmr.msra.gmra.mxu0 %vm66_vm0, %v140_v4  ;;  %139 = vmatmul.msk.bf16.vlgmr.msra.gmra.mxu1 %vm66_vm0, %v141_v5 }
  0x8e   :  { %v82_v7 = vpop.f32.mrf.mxu0  ;;  %v87_v8 = vpop.f32.mrf.mxu1 }
  0x8f   :  { %v83_v9 = vadd.f32 %v153_v6, %v82_v7  ;;  %v88_v10 = vadd.f32 %v153_v6, %v87_v8 }
  0x91   :  { %92 = vst [vmem:[#allocation2] sm:$0xff] %v83_v9 }
  0x92   :  { %94 = vst [vmem:[#allocation2 + $0x10] sm:$0xff] %v88_v10 }
  0x96   :  { %v84_v11 = vpop.f32.mrf.mxu0  ;;  %v89_v12 = vpop.f32.mrf.mxu1 }
  0x97   :  { %v85_v13 = vadd.f32 %v153_v6, %v84_v11  ;;  %v90_v14 = vadd.f32 %v153_v6, %v89_v12 }
  0x99   :  { %93 = vst [vmem:[#allocation2 + $0x8] sm:$0xff] %v85_v13 }
  0x9a   :  { %95 = vst [vmem:[#allocation2 + $0x18] sm:$0xff] %v90_v14 }
  0x9b   :  { %108 = dma.vmem_to_hbm [thread:$0]  %s101_s26, 512, %s103_s0, [#allocation3], %s181_s2, %s181_s2, %s182_s29  }
  0x9c   :  { %178 = dma.done.wait [#allocation3], 512  }
  0x9d   :  { %179 = vsyncadd [#allocation3], 4294966784 }
  0x9e   :  { %113 = vsyncpa [#allocation3], 1 }

</bundles_post_ra>
